<compile_context>
chip_gen: v7x
topology: tpu7x:2x2x1
jax: 0.10.0
libtpu: 0.0.40
codegen_flags: <defaults>
</compile_context>

<pallas_src>
import functools

import jax
import jax.numpy as jnp
from jax.experimental import pallas as pl
from jax.experimental.pallas import tpu as pltpu

EPS = 1e-5


def _round_up(x, m):
    return (x + m - 1) // m * m


def _vmem_capacity_bytes():
    """Physical VMEM of the current chip; conservative v7x-safe fallback."""
    try:
        return int(pltpu.get_tpu_info().vmem_capacity_bytes)
    except Exception:
        return 64 * 1024 * 1024


def _choose_tile_n(n, in_dim, hid_p, out_dim, budget_bytes):
    """Largest N tile (multiple of 16) whose heaviest phase fits the VMEM budget."""
    in_lp = _round_up(in_dim, 128)
    out_lp = _round_up(out_dim, 128)
    # Weights & folded scale/shift are double-buffered by the default pipeline even
    # though their index_map is constant -> count them twice.
    resident = 2 * (2 * (in_dim * hid_p + hid_p * out_lp)
                    + 4 * 2 * (hid_p + out_lp)
                    + 4 * 8 * out_lp)                 # stats output block
    avail = max(budget_bytes - resident, 2 * 1024 * 1024)
    # Heaviest per-row working set (phase 3): double-buffered f32 h tile, f32 z,
    # f32+bf16 x, f32 y, double-buffered f32 output tile.
    per_row = 8 * in_lp + 10 * hid_p + 4 * out_lp + 8 * out_lp
    cap = 2048 if budget_bytes >= 64 * 1024 * 1024 else 1024
    tn = max(16, min(cap, (avail // per_row) // 16 * 16))
    # Keep >= 4 N tiles when possible so v7x's two TensorCores can split the
    # "parallel" grid axis (harmless on 1-TC chips).
    tn = min(tn, max(16, _round_up(-(-n // 4), 16)))
    return int(min(tn, _round_up(n, 16)))


def _pack_stats(s, ss):
    """(1, D) sum & sum-of-squares -> (1, 8, D) block: row0=sum, row1=sumsq, rest 0."""
    d = s.shape[-1]
    row = jax.lax.broadcasted_iota(jnp.int32, (8, d), 0)
    return jnp.where(row == 0, s, jnp.where(row == 1, ss, 0.0))[None]


# ---------------- Phase 1: per-tile stats of z = h @ W1 ----------------
def _stats1_kernel(h_ref, w1_ref, stats_ref, *, tile_n, n_valid, needs_mask):
    # Bias is a per-channel constant shift (moves mean, not variance) -> folded later.
    z = jnp.dot(h_ref[...].astype(jnp.bfloat16), w1_ref[...],
                preferred_element_type=jnp.float32)
    if needs_mask:  # static bool: last N block extends past n (undefined padding rows)
        row = (pl.program_id(0) * tile_n
               + jax.lax.broadcasted_iota(jnp.int32, (tile_n, 1), 0))
        z = jnp.where(row < n_valid, z, 0.0)   # select: kills even NaN garbage
    stats_ref[...] = _pack_stats(jnp.sum(z, axis=0, keepdims=True),
                                 jnp.sum(z * z, axis=0, keepdims=True))


# ---- Phase 2: recompute z, folded BN1 + ReLU, Linear2, per-tile stats of y ----
def _stats2_kernel(h_ref, w1_ref, sc1_ref, sh1_ref, w2_ref, stats_ref,
                   *, tile_n, n_valid, needs_mask):
    z = jnp.dot(h_ref[...].astype(jnp.bfloat16), w1_ref[...],
                preferred_element_type=jnp.float32)
    x = jnp.maximum(z * sc1_ref[...] + sh1_ref[...], 0.0)      # bias+BN1 folded, ReLU
    y = jnp.dot(x.astype(jnp.bfloat16), w2_ref[...],
                preferred_element_type=jnp.float32)
    if needs_mask:
        row = (pl.program_id(0) * tile_n
               + jax.lax.broadcasted_iota(jnp.int32, (tile_n, 1), 0))
        y = jnp.where(row < n_valid, y, 0.0)
    stats_ref[...] = _pack_stats(jnp.sum(y, axis=0, keepdims=True),
                                 jnp.sum(y * y, axis=0, keepdims=True))


# ---- Phase 3: recompute z -> x -> y, folded BN2 + ReLU, write final output ----
def _final_kernel(h_ref, w1_ref, sc1_ref, sh1_ref, w2_ref, sc2_ref, sh2_ref, o_ref,
                  *, out_dim):
    z = jnp.dot(h_ref[...].astype(jnp.bfloat16), w1_ref[...],
                preferred_element_type=jnp.float32)
    x = jnp.maximum(z * sc1_ref[...] + sh1_ref[...], 0.0)
    y = jnp.dot(x.astype(jnp.bfloat16), w2_ref[...],
                preferred_element_type=jnp.float32)
    out = jnp.maximum(y * sc2_ref[...] + sh2_ref[...], 0.0)
    # Write only the logical channels; the partial last row block is clipped by Pallas.
    o_ref[...] = out[:, :out_dim].astype(o_ref.dtype)


def _fold_bn(stats, n, bias, gamma, beta):
    """Given per-tile (sum, sumsq) of the pre-bias linear output, produce per-channel
    (scale, shift) such that BN_train(z + bias) == z * scale + shift.
    Note: single-pass E[z^2]-E[z]^2 in f32 (fine at GIN magnitudes; see review)."""
    s = jnp.sum(stats[:, 0, :], axis=0)
    ss = jnp.sum(stats[:, 1, :], axis=0)
    mean_nob = s / n
    var = jnp.maximum(ss / n - mean_nob * mean_nob, 0.0)   # biased var; shift-invariant
    mu = mean_nob + bias                                   # mean of (z + bias)
    scale = gamma * jax.lax.rsqrt(var + EPS)
    shift = (bias - mu) * scale + beta
    return scale[None, :], shift[None, :]


def apply_node_func(h, params, *, tile_n=None):
    """Fused GIN node update: relu(BN2(Linear2(relu(BN1(Linear1(h)))))).
    h: (N, in_dim) float32. Returns (N, out_dim) float32 (training-mode batch stats)."""
    n, in_dim = h.shape
    hidden = params["w1"].shape[1]
    out_dim = params["w2"].shape[1]

    # Internal channel dims padded to multiples of 128 (lane-dense MXU intermediates).
    hid_p = _round_up(hidden, 128)
    out_p = _round_up(out_dim, 128)

    phys_vmem = _vmem_capacity_bytes()
    budget = int(phys_vmem * 0.60)                       # ~38 MiB v7x / ~76 MiB v5e/v6e
    vmem_limit = min(int(phys_vmem * 0.75), 112 * 1024 * 1024)
    cparams = pltpu.CompilerParams(dimension_semantics=("parallel",),
                                   vmem_limit_bytes=vmem_limit)

    tn = tile_n if tile_n is not None else _choose_tile_n(n, in_dim, hid_p, out_dim,
                                                          budget)
    tn = max(16, _round_up(tn, 16))
    nt = -(-n // tn)
    needs_mask = (nt * tn != n)

    f32, bf16 = jnp.float32, jnp.bfloat16
    h = h.astype(f32)        # no pad/cast prologue; h streamed as-is
    w1 = jnp.pad(params["w1"], ((0, 0), (0, hid_p - hidden))).astype(bf16)
    w2 = jnp.pad(params["w2"], ((0, hid_p - hidden), (0, out_p - out_dim))).astype(bf16)
    b1 = jnp.pad(params["b1"].reshape(-1), (0, hid_p - hidden))
    g1 = jnp.pad(params["gamma1"].reshape(-1), (0, hid_p - hidden))
    bt1 = jnp.pad(params["beta1"].reshape(-1), (0, hid_p - hidden))
    b2 = jnp.pad(params["b2"].reshape(-1), (0, out_p - out_dim))
    g2 = jnp.pad(params["gamma2"].reshape(-1), (0, out_p - out_dim))
    bt2 = jnp.pad(params["beta2"].reshape(-1), (0, out_p - out_dim))

    h_spec = pl.BlockSpec((tn, in_dim), lambda i: (i, 0))
    w1_spec = pl.BlockSpec((in_dim, hid_p), lambda i: (0, 0))     # VMEM-resident
    w2_spec = pl.BlockSpec((hid_p, out_p), lambda i: (0, 0))      # VMEM-resident
    vec_h = lambda: pl.BlockSpec((1, hid_p), lambda i: (0, 0))
    vec_o = lambda: pl.BlockSpec((1, out_p), lambda i: (0, 0))

    # ---- Phase 1: stats of z = h @ W1 over the full batch ----
    stats1 = pl.pallas_call(
        functools.partial(_stats1_kernel, tile_n=tn, n_valid=n, needs_mask=needs_mask),
        out_shape=jax.ShapeDtypeStruct((nt, 8, hid_p), f32),
        grid=(nt,),
        in_specs=[h_spec, w1_spec],
        out_specs=pl.BlockSpec((1, 8, hid_p), lambda i: (i, 0, 0)),
        compiler_params=cparams,
    )(h, w1)
    sc1, sh1 = _fold_bn(stats1, n, b1, g1, bt1)

    # ---- Phase 2: BN1+ReLU, Linear2, stats of y (no y written to HBM) ----
    stats2 = pl.pallas_call(
        functools.partial(_stats2_kernel, tile_n=tn, n_valid=n, needs_mask=needs_mask),
        out_shape=jax.ShapeDtypeStruct((nt, 8, out_p), f32),
        grid=(nt,),
        in_specs=[h_spec, w1_spec, vec_h(), vec_h(), w2_spec],
        out_specs=pl.BlockSpec((1, 8, out_p), lambda i: (i, 0, 0)),
        compiler_params=cparams,
    )(h, w1, sc1, sh1, w2)
    sc2, sh2 = _fold_bn(stats2, n, b2, g2, bt2)

    # ---- Phase 3: recompute, BN2 + ReLU, write final (N, out_dim) directly ----
    out = pl.pallas_call(
        functools.partial(_final_kernel, out_dim=out_dim),
        out_shape=jax.ShapeDtypeStruct((n, out_dim), f32),
        grid=(nt,),
        in_specs=[h_spec, w1_spec, vec_h(), vec_h(), w2_spec, vec_o(), vec_o()],
        out_specs=pl.BlockSpec((tn, out_dim), lambda i: (i, 0)),
        compiler_params=cparams,
    )(h, w1, sc1, sh1, w2, sc2, sh2)
    return out


def init_params(key, in_dim, hidden_dim, out_dim):
    """Deterministic synthetic init (PyTorch-Linear-style uniform)."""
    k1, k2, k3, k4 = jax.random.split(key, 4)
    lim1 = 1.0 / jnp.sqrt(in_dim)
    lim2 = 1.0 / jnp.sqrt(hidden_dim)
    return {
        # Linear weights stored as (in, out) so the kernel does x @ W
        "w1": jax.random.uniform(k1, (in_dim, hidden_dim), jnp.float32, -lim1, lim1),
        "b1": jax.random.uniform(k2, (1, hidden_dim), jnp.float32, -lim1, lim1),
        "gamma1": jnp.ones((1, hidden_dim), jnp.float32),   # MLP's internal BN
        "beta1": jnp.zeros((1, hidden_dim), jnp.float32),
        "w2": jax.random.uniform(k3, (hidden_dim, out_dim), jnp.float32, -lim2, lim2),
        "b2": jax.random.uniform(k4, (1, out_dim), jnp.float32, -lim2, lim2),
        "gamma2": jnp.ones((1, out_dim), jnp.float32),       # ApplyNodeFunc.bn
        "beta2": jnp.zeros((1, out_dim), jnp.float32),
    }


def _reference(h, p):
    """Plain-JAX reference mirroring the kernel's bf16-matmul / f32-stats numerics."""
    bf16, f32 = jnp.bfloat16, jnp.float32
    z = jnp.dot(h.astype(bf16), p["w1"].astype(bf16),
                preferred_element_type=f32) + p["b1"]
    mu = z.mean(0, keepdims=True)
    var = ((z - mu) ** 2).mean(0, keepdims=True)
    x = jnp.maximum((z - mu) * jax.lax.rsqrt(var + EPS) * p["gamma1"] + p["beta1"], 0.0)
    y = jnp.dot(x.astype(bf16), p["w2"].astype(bf16),
                preferred_element_type=f32) + p["b2"]
    mu = y.mean(0, keepdims=True)
    var = ((y - mu) ** 2).mean(0, keepdims=True)
    y = (y - mu) * jax.lax.rsqrt(var + EPS) * p["gamma2"] + p["beta2"]
    return jnp.maximum(y, 0.0)


if __name__ == "__main__":
    # Small shapes; N=30 with tile_n=16 exercises the multi-tile grid, the partial
    # last block (row masking of the batch statistics + clipped output writes) and
    # the sub-128-lane direct output store (out_dim=24).
    N, IN_DIM, HIDDEN_DIM, OUT_DIM = 30, 16, 32, 24

    key = jax.random.PRNGKey(0)
    k_h, k_p = jax.random.split(key)
    h = jax.random.normal(k_h, (N, IN_DIM), jnp.float32)
    params = init_params(k_p, IN_DIM, HIDDEN_DIM, OUT_DIM)

    apply_fn = jax.jit(apply_node_func, static_argnames=("tile_n",))
    out = apply_fn(h, params, tile_n=16)
    out = jax.block_until_ready(out)

    ref = _reference(h, params)
    assert out.shape == (N, OUT_DIM)
    assert bool(jnp.all(jnp.isfinite(out)))
    err = float(jnp.max(jnp.abs(out - ref)))
    assert jnp.allclose(out, ref, atol=2e-2, rtol=2e-2), f"max abs err {err}"
    print("KERNEL_OK")
</pallas_src>

<mosaic_0001>
module attributes {stable_mosaic.version = 11 : i64} {
  func.func @_stats1_kernel(%arg0: i32, %arg1: memref<16x16xf32, #tpu.memory_space<vmem>>, %arg2: memref<16x128xbf16, #tpu.memory_space<vmem>>, %arg3: memref<1x8x128xf32, #tpu.memory_space<vmem>>) attributes {dimension_semantics = [#tpu.dimension_semantics<parallel>], iteration_bounds = array<i64: 2>, scalar_prefetch = 0 : i64, scratch_operands = 0 : i64, tpu.core_type = #tpu.core_type<tc>, window_params = [{transform_indices = @transform_0, window_bounds = array<i64: 16, 16>}, {pipeline_mode = #tpu.pipeline_mode<synchronous>, transform_indices = @transform_1, window_bounds = array<i64: 16, 128>}, {transform_indices = @transform_2, window_bounds = array<i64: 1, 8, 128>}]} {
    %c0 = arith.constant 0 : index
    %c0_0 = arith.constant 0 : index
    %0 = vector.load %arg1[%c0, %c0_0] : memref<16x16xf32, #tpu.memory_space<vmem>>, vector<16x16xf32>
    %1 = arith.truncf %0 : vector<16x16xf32> to vector<16x16xbf16>
    %c0_1 = arith.constant 0 : index
    %c0_2 = arith.constant 0 : index
    %2 = vector.load %arg2[%c0_1, %c0_2] : memref<16x128xbf16, #tpu.memory_space<vmem>>, vector<16x128xbf16>
    %cst = arith.constant dense<0.000000e+00> : vector<16x128xf32>
    %3 = tpu.matmul %1, %2, %cst {dimension_numbers = #tpu.dot_dimension_numbers<[1], [0], [0], [1], [0, 0, 1, 1], [], []>} : vector<16x16xbf16>, vector<16x128xbf16>, vector<16x128xf32> -> vector<16x128xf32>
    %c16_i32 = arith.constant 16 : i32
    %4 = arith.muli %arg0, %c16_i32 : i32
    %5 = tpu.iota {dimensions = array<i32: 0>} : vector<16x1xi32>
    %6 = vector.broadcast %4 : i32 to vector<16x1xi32>
    %7 = arith.addi %6, %5 : vector<16x1xi32>
    %c30_i32 = arith.constant 30 : i32
    %8 = vector.broadcast %c30_i32 : i32 to vector<16x1xi32>
    %9 = arith.cmpi slt, %7, %8 : vector<16x1xi32>
    %cst_3 = arith.constant 0.000000e+00 : f32
    %10 = vector.shape_cast %9 : vector<16x1xi1> to vector<16x1xi1>
    %11 = vector.broadcast %10 : vector<16x1xi1> to vector<16x128xi1>
    %12 = vector.broadcast %cst_3 : f32 to vector<16x128xf32>
    %13 = arith.select %11, %3, %12 : vector<16x128xi1>, vector<16x128xf32>
    %cst_4 = arith.constant dense<0.000000e+00> : vector<128xf32>
    %14 = vector.multi_reduction <add>, %13, %cst_4 [0] : vector<16x128xf32> to vector<128xf32>
    %15 = vector.shape_cast %14 : vector<128xf32> to vector<1x128xf32>
    %16 = arith.mulf %13, %13 : vector<16x128xf32>
    %cst_5 = arith.constant dense<0.000000e+00> : vector<128xf32>
    %17 = vector.multi_reduction <add>, %16, %cst_5 [0] : vector<16x128xf32> to vector<128xf32>
    %18 = vector.shape_cast %17 : vector<128xf32> to vector<1x128xf32>
    %19 = tpu.iota {dimensions = array<i32: 0>} : vector<8x128xi32>
    %c0_i32 = arith.constant 0 : i32
    %20 = vector.broadcast %c0_i32 : i32 to vector<8x128xi32>
    %21 = arith.cmpi eq, %19, %20 : vector<8x128xi32>
    %c1_i32 = arith.constant 1 : i32
    %22 = vector.broadcast %c1_i32 : i32 to vector<8x128xi32>
    %23 = arith.cmpi eq, %19, %22 : vector<8x128xi32>
    %cst_6 = arith.constant 0.000000e+00 : f32
    %24 = vector.shape_cast %18 : vector<1x128xf32> to vector<1x128xf32>
    %25 = vector.broadcast %24 : vector<1x128xf32> to vector<8x128xf32>
    %26 = vector.broadcast %cst_6 : f32 to vector<8x128xf32>
    %27 = arith.select %23, %25, %26 : vector<8x128xi1>, vector<8x128xf32>
    %28 = vector.shape_cast %15 : vector<1x128xf32> to vector<1x128xf32>
    %29 = vector.broadcast %28 : vector<1x128xf32> to vector<8x128xf32>
    %30 = arith.select %21, %29, %27 : vector<8x128xi1>, vector<8x128xf32>
    %31 = vector.shape_cast %30 : vector<8x128xf32> to vector<1x8x128xf32>
    %c0_7 = arith.constant 0 : index
    %c0_8 = arith.constant 0 : index
    %c0_9 = arith.constant 0 : index
    %32 = vector.load %arg3[%c0_7, %c0_8, %c0_9] : memref<1x8x128xf32, #tpu.memory_space<vmem>>, vector<1x8x128xf32>
    tpu.vector_store %arg3[%c0_7, %c0_8, %c0_9], %31 {strides = array<i32>} : memref<1x8x128xf32, #tpu.memory_space<vmem>>, vector<1x8x128xf32>,
    return
  }
  func.func @transform_0(%arg0: i32) -> (i32, i32) {
    %c0_i32 = arith.constant 0 : i32
    %c0_i32_0 = arith.constant 0 : i32
    return %arg0, %c0_i32 : i32, i32
  }
  func.func @transform_1(%arg0: i32) -> (i32, i32) {
    %c0_i32 = arith.constant 0 : i32
    %c0_i32_0 = arith.constant 0 : i32
    %c0_i32_1 = arith.constant 0 : i32
    return %c0_i32, %c0_i32_0 : i32, i32
  }
  func.func @transform_2(%arg0: i32) -> (i32, i32, i32) {
    %c0_i32 = arith.constant 0 : i32
    %c0_i32_0 = arith.constant 0 : i32
    %c0_i32_1 = arith.constant 0 : i32
    return %arg0, %c0_i32, %c0_i32_0 : i32, i32, i32
  }
}

module attributes {stable_mosaic.version = 11 : i64} {
  func.func @_final_kernel(%arg0: i32, %arg1: memref<16x16xf32, #tpu.memory_space<vmem>>, %arg2: memref<16x128xbf16, #tpu.memory_space<vmem>>, %arg3: memref<1x128xf32, #tpu.memory_space<vmem>>, %arg4: memref<1x128xf32, #tpu.memory_space<vmem>>, %arg5: memref<128x128xbf16, #tpu.memory_space<vmem>>, %arg6: memref<1x128xf32, #tpu.memory_space<vmem>>, %arg7: memref<1x128xf32, #tpu.memory_space<vmem>>, %arg8: memref<16x24xf32, #tpu.memory_space<vmem>>) attributes {dimension_semantics = [#tpu.dimension_semantics<parallel>], iteration_bounds = array<i64: 2>, scalar_prefetch = 0 : i64, scratch_operands = 0 : i64, tpu.core_type = #tpu.core_type<tc>, window_params = [{transform_indices = @transform_0, window_bounds = array<i64: 16, 16>}, {pipeline_mode = #tpu.pipeline_mode<synchronous>, transform_indices = @transform_1, window_bounds = array<i64: 16, 128>}, {pipeline_mode = #tpu.pipeline_mode<synchronous>, transform_indices = @transform_2, window_bounds = array<i64: 1, 128>}, {pipeline_mode = #tpu.pipeline_mode<synchronous>, transform_indices = @transform_3, window_bounds = array<i64: 1, 128>}, {pipeline_mode = #tpu.pipeline_mode<synchronous>, transform_indices = @transform_4, window_bounds = array<i64: 128, 128>}, {pipeline_mode = #tpu.pipeline_mode<synchronous>, transform_indices = @transform_5, window_bounds = array<i64: 1, 128>}, {pipeline_mode = #tpu.pipeline_mode<synchronous>, transform_indices = @transform_6, window_bounds = array<i64: 1, 128>}, {transform_indices = @transform_7, window_bounds = array<i64: 16, 24>}]} {
    %c0 = arith.constant 0 : index
    %c0_0 = arith.constant 0 : index
    %0 = vector.load %arg1[%c0, %c0_0] : memref<16x16xf32, #tpu.memory_space<vmem>>, vector<16x16xf32>
    %1 = arith.truncf %0 : vector<16x16xf32> to vector<16x16xbf16>
    %c0_1 = arith.constant 0 : index
    %c0_2 = arith.constant 0 : index
    %2 = vector.load %arg2[%c0_1, %c0_2] : memref<16x128xbf16, #tpu.memory_space<vmem>>, vector<16x128xbf16>
    %cst = arith.constant dense<0.000000e+00> : vector<16x128xf32>
    %3 = tpu.matmul %1, %2, %cst {dimension_numbers = #tpu.dot_dimension_numbers<[1], [0], [0], [1], [0, 0, 1, 1], [], []>} : vector<16x16xbf16>, vector<16x128xbf16>, vector<16x128xf32> -> vector<16x128xf32>
    %c0_3 = arith.constant 0 : index
    %c0_4 = arith.constant 0 : index
    %4 = vector.load %arg3[%c0_3, %c0_4] : memref<1x128xf32, #tpu.memory_space<vmem>>, vector<1x128xf32>
    %5 = vector.broadcast %4 : vector<1x128xf32> to vector<16x128xf32>
    %6 = arith.mulf %3, %5 : vector<16x128xf32>
    %c0_5 = arith.constant 0 : index
    %c0_6 = arith.constant 0 : index
    %7 = vector.load %arg4[%c0_5, %c0_6] : memref<1x128xf32, #tpu.memory_space<vmem>>, vector<1x128xf32>
    %8 = vector.broadcast %7 : vector<1x128xf32> to vector<16x128xf32>
    %9 = arith.addf %6, %8 : vector<16x128xf32>
    %cst_7 = arith.constant 0.000000e+00 : f32
    %10 = vector.broadcast %cst_7 : f32 to vector<16x128xf32>
    %11 = arith.maximumf %9, %10 : vector<16x128xf32>
    %12 = arith.truncf %11 : vector<16x128xf32> to vector<16x128xbf16>
    %c0_8 = arith.constant 0 : index
    %c0_9 = arith.constant 0 : index
    %13 = vector.load %arg5[%c0_8, %c0_9] : memref<128x128xbf16, #tpu.memory_space<vmem>>, vector<128x128xbf16>
    %cst_10 = arith.constant dense<0.000000e+00> : vector<16x128xf32>
    %14 = tpu.matmul %12, %13, %cst_10 {dimension_numbers = #tpu.dot_dimension_numbers<[1], [0], [0], [1], [0, 0, 1, 1], [], []>} : vector<16x128xbf16>, vector<128x128xbf16>, vector<16x128xf32> -> vector<16x128xf32>
    %c0_11 = arith.constant 0 : index
    %c0_12 = arith.constant 0 : index
    %15 = vector.load %arg6[%c0_11, %c0_12] : memref<1x128xf32, #tpu.memory_space<vmem>>, vector<1x128xf32>
    %16 = vector.broadcast %15 : vector<1x128xf32> to vector<16x128xf32>
    %17 = arith.mulf %14, %16 : vector<16x128xf32>
    %c0_13 = arith.constant 0 : index
    %c0_14 = arith.constant 0 : index
    %18 = vector.load %arg7[%c0_13, %c0_14] : memref<1x128xf32, #tpu.memory_space<vmem>>, vector<1x128xf32>
    %19 = vector.broadcast %18 : vector<1x128xf32> to vector<16x128xf32>
    %20 = arith.addf %17, %19 : vector<16x128xf32>
    %cst_15 = arith.constant 0.000000e+00 : f32
    %21 = vector.broadcast %cst_15 : f32 to vector<16x128xf32>
    %22 = arith.maximumf %20, %21 : vector<16x128xf32>
    %23 = vector.extract_strided_slice %22 {offsets = [0, 0], sizes = [16, 24], strides = [1, 1]} : vector<16x128xf32> to vector<16x24xf32>
    %c0_16 = arith.constant 0 : index
    %c0_17 = arith.constant 0 : index
    %24 = vector.load %arg8[%c0_16, %c0_17] : memref<16x24xf32, #tpu.memory_space<vmem>>, vector<16x24xf32>
    tpu.vector_store %arg8[%c0_16, %c0_17], %23 {strides = array<i32>} : memref<16x24xf32, #tpu.memory_space<vmem>>, vector<16x24xf32>,
    return
  }
  func.func @transform_0(%arg0: i32) -> (i32, i32) {
    %c0_i32 = arith.constant 0 : i32
    %c0_i32_0 = arith.constant 0 : i32
    return %arg0, %c0_i32 : i32, i32
  }
  func.func @transform_1(%arg0: i32) -> (i32, i32) {
    %c0_i32 = arith.constant 0 : i32
    %c0_i32_0 = arith.constant 0 : i32
    %c0_i32_1 = arith.constant 0 : i32
    return %c0_i32, %c0_i32_0 : i32, i32
  }
  func.func @transform_2(%arg0: i32) -> (i32, i32) {
    %c0_i32 = arith.constant 0 : i32
    %c0_i32_0 = arith.constant 0 : i32
    %c0_i32_1 = arith.constant 0 : i32
    return %c0_i32, %c0_i32_0 : i32, i32
  }
  func.func @transform_3(%arg0: i32) -> (i32, i32) {
    %c0_i32 = arith.constant 0 : i32
    %c0_i32_0 = arith.constant 0 : i32
    %c0_i32_1 = arith.constant 0 : i32
    return %c0_i32, %c0_i32_0 : i32, i32
  }
  func.func @transform_4(%arg0: i32) -> (i32, i32) {
    %c0_i32 = arith.constant 0 : i32
    %c0_i32_0 = arith.constant 0 : i32
    %c0_i32_1 = arith.constant 0 : i32
    return %c0_i32, %c0_i32_0 : i32, i32
  }
  func.func @transform_5(%arg0: i32) -> (i32, i32) {
    %c0_i32 = arith.constant 0 : i32
    %c0_i32_0 = arith.constant 0 : i32
    %c0_i32_1 = arith.constant 0 : i32
    return %c0_i32, %c0_i32_0 : i32, i32
  }
  func.func @transform_6(%arg0: i32) -> (i32, i32) {
    %c0_i32 = arith.constant 0 : i32
    %c0_i32_0 = arith.constant 0 : i32
    %c0_i32_1 = arith.constant 0 : i32
    return %c0_i32, %c0_i32_0 : i32, i32
  }
  func.func @transform_7(%arg0: i32) -> (i32, i32) {
    %c0_i32 = arith.constant 0 : i32
    %c0_i32_0 = arith.constant 0 : i32
    return %arg0, %c0_i32 : i32, i32
  }
}

module attributes {stable_mosaic.version = 11 : i64} {
  func.func @_stats2_kernel(%arg0: i32, %arg1: memref<16x16xf32, #tpu.memory_space<vmem>>, %arg2: memref<16x128xbf16, #tpu.memory_space<vmem>>, %arg3: memref<1x128xf32, #tpu.memory_space<vmem>>, %arg4: memref<1x128xf32, #tpu.memory_space<vmem>>, %arg5: memref<128x128xbf16, #tpu.memory_space<vmem>>, %arg6: memref<1x8x128xf32, #tpu.memory_space<vmem>>) attributes {dimension_semantics = [#tpu.dimension_semantics<parallel>], iteration_bounds = array<i64: 2>, scalar_prefetch = 0 : i64, scratch_operands = 0 : i64, tpu.core_type = #tpu.core_type<tc>, window_params = [{transform_indices = @transform_0, window_bounds = array<i64: 16, 16>}, {pipeline_mode = #tpu.pipeline_mode<synchronous>, transform_indices = @transform_1, window_bounds = array<i64: 16, 128>}, {pipeline_mode = #tpu.pipeline_mode<synchronous>, transform_indices = @transform_2, window_bounds = array<i64: 1, 128>}, {pipeline_mode = #tpu.pipeline_mode<synchronous>, transform_indices = @transform_3, window_bounds = array<i64: 1, 128>}, {pipeline_mode = #tpu.pipeline_mode<synchronous>, transform_indices = @transform_4, window_bounds = array<i64: 128, 128>}, {transform_indices = @transform_5, window_bounds = array<i64: 1, 8, 128>}]} {
    %c0 = arith.constant 0 : index
    %c0_0 = arith.constant 0 : index
    %0 = vector.load %arg1[%c0, %c0_0] : memref<16x16xf32, #tpu.memory_space<vmem>>, vector<16x16xf32>
    %1 = arith.truncf %0 : vector<16x16xf32> to vector<16x16xbf16>
    %c0_1 = arith.constant 0 : index
    %c0_2 = arith.constant 0 : index
    %2 = vector.load %arg2[%c0_1, %c0_2] : memref<16x128xbf16, #tpu.memory_space<vmem>>, vector<16x128xbf16>
    %cst = arith.constant dense<0.000000e+00> : vector<16x128xf32>
    %3 = tpu.matmul %1, %2, %cst {dimension_numbers = #tpu.dot_dimension_numbers<[1], [0], [0], [1], [0, 0, 1, 1], [], []>} : vector<16x16xbf16>, vector<16x128xbf16>, vector<16x128xf32> -> vector<16x128xf32>
    %c0_3 = arith.constant 0 : index
    %c0_4 = arith.constant 0 : index
    %4 = vector.load %arg3[%c0_3, %c0_4] : memref<1x128xf32, #tpu.memory_space<vmem>>, vector<1x128xf32>
    %5 = vector.broadcast %4 : vector<1x128xf32> to vector<16x128xf32>
    %6 = arith.mulf %3, %5 : vector<16x128xf32>
    %c0_5 = arith.constant 0 : index
    %c0_6 = arith.constant 0 : index
    %7 = vector.load %arg4[%c0_5, %c0_6] : memref<1x128xf32, #tpu.memory_space<vmem>>, vector<1x128xf32>
    %8 = vector.broadcast %7 : vector<1x128xf32> to vector<16x128xf32>
    %9 = arith.addf %6, %8 : vector<16x128xf32>
    %cst_7 = arith.constant 0.000000e+00 : f32
    %10 = vector.broadcast %cst_7 : f32 to vector<16x128xf32>
    %11 = arith.maximumf %9, %10 : vector<16x128xf32>
    %12 = arith.truncf %11 : vector<16x128xf32> to vector<16x128xbf16>
    %c0_8 = arith.constant 0 : index
    %c0_9 = arith.constant 0 : index
    %13 = vector.load %arg5[%c0_8, %c0_9] : memref<128x128xbf16, #tpu.memory_space<vmem>>, vector<128x128xbf16>
    %cst_10 = arith.constant dense<0.000000e+00> : vector<16x128xf32>
    %14 = tpu.matmul %12, %13, %cst_10 {dimension_numbers = #tpu.dot_dimension_numbers<[1], [0], [0], [1], [0, 0, 1, 1], [], []>} : vector<16x128xbf16>, vector<128x128xbf16>, vector<16x128xf32> -> vector<16x128xf32>
    %c16_i32 = arith.constant 16 : i32
    %15 = arith.muli %arg0, %c16_i32 : i32
    %16 = tpu.iota {dimensions = array<i32: 0>} : vector<16x1xi32>
    %17 = vector.broadcast %15 : i32 to vector<16x1xi32>
    %18 = arith.addi %17, %16 : vector<16x1xi32>
    %c30_i32 = arith.constant 30 : i32
    %19 = vector.broadcast %c30_i32 : i32 to vector<16x1xi32>
    %20 = arith.cmpi slt, %18, %19 : vector<16x1xi32>
    %cst_11 = arith.constant 0.000000e+00 : f32
    %21 = vector.shape_cast %20 : vector<16x1xi1> to vector<16x1xi1>
    %22 = vector.broadcast %21 : vector<16x1xi1> to vector<16x128xi1>
    %23 = vector.broadcast %cst_11 : f32 to vector<16x128xf32>
    %24 = arith.select %22, %14, %23 : vector<16x128xi1>, vector<16x128xf32>
    %cst_12 = arith.constant dense<0.000000e+00> : vector<128xf32>
    %25 = vector.multi_reduction <add>, %24, %cst_12 [0] : vector<16x128xf32> to vector<128xf32>
    %26 = vector.shape_cast %25 : vector<128xf32> to vector<1x128xf32>
    %27 = arith.mulf %24, %24 : vector<16x128xf32>
    %cst_13 = arith.constant dense<0.000000e+00> : vector<128xf32>
    %28 = vector.multi_reduction <add>, %27, %cst_13 [0] : vector<16x128xf32> to vector<128xf32>
    %29 = vector.shape_cast %28 : vector<128xf32> to vector<1x128xf32>
    %30 = tpu.iota {dimensions = array<i32: 0>} : vector<8x128xi32>
    %c0_i32 = arith.constant 0 : i32
    %31 = vector.broadcast %c0_i32 : i32 to vector<8x128xi32>
    %32 = arith.cmpi eq, %30, %31 : vector<8x128xi32>
    %c1_i32 = arith.constant 1 : i32
    %33 = vector.broadcast %c1_i32 : i32 to vector<8x128xi32>
    %34 = arith.cmpi eq, %30, %33 : vector<8x128xi32>
    %cst_14 = arith.constant 0.000000e+00 : f32
    %35 = vector.shape_cast %29 : vector<1x128xf32> to vector<1x128xf32>
    %36 = vector.broadcast %35 : vector<1x128xf32> to vector<8x128xf32>
    %37 = vector.broadcast %cst_14 : f32 to vector<8x128xf32>
    %38 = arith.select %34, %36, %37 : vector<8x128xi1>, vector<8x128xf32>
    %39 = vector.shape_cast %26 : vector<1x128xf32> to vector<1x128xf32>
    %40 = vector.broadcast %39 : vector<1x128xf32> to vector<8x128xf32>
    %41 = arith.select %32, %40, %38 : vector<8x128xi1>, vector<8x128xf32>
    %42 = vector.shape_cast %41 : vector<8x128xf32> to vector<1x8x128xf32>
    %c0_15 = arith.constant 0 : index
    %c0_16 = arith.constant 0 : index
    %c0_17 = arith.constant 0 : index
    %43 = vector.load %arg6[%c0_15, %c0_16, %c0_17] : memref<1x8x128xf32, #tpu.memory_space<vmem>>, vector<1x8x128xf32>
    tpu.vector_store %arg6[%c0_15, %c0_16, %c0_17], %42 {strides = array<i32>} : memref<1x8x128xf32, #tpu.memory_space<vmem>>, vector<1x8x128xf32>,
    return
  }
  func.func @transform_0(%arg0: i32) -> (i32, i32) {
    %c0_i32 = arith.constant 0 : i32
    %c0_i32_0 = arith.constant 0 : i32
    return %arg0, %c0_i32 : i32, i32
  }
  func.func @transform_1(%arg0: i32) -> (i32, i32) {
    %c0_i32 = arith.constant 0 : i32
    %c0_i32_0 = arith.constant 0 : i32
    %c0_i32_1 = arith.constant 0 : i32
    return %c0_i32, %c0_i32_0 : i32, i32
  }
  func.func @transform_2(%arg0: i32) -> (i32, i32) {
    %c0_i32 = arith.constant 0 : i32
    %c0_i32_0 = arith.constant 0 : i32
    %c0_i32_1 = arith.constant 0 : i32
    return %c0_i32, %c0_i32_0 : i32, i32
  }
  func.func @transform_3(%arg0: i32) -> (i32, i32) {
    %c0_i32 = arith.constant 0 : i32
    %c0_i32_0 = arith.constant 0 : i32
    %c0_i32_1 = arith.constant 0 : i32
    return %c0_i32, %c0_i32_0 : i32, i32
  }
  func.func @transform_4(%arg0: i32) -> (i32, i32) {
    %c0_i32 = arith.constant 0 : i32
    %c0_i32_0 = arith.constant 0 : i32
    %c0_i32_1 = arith.constant 0 : i32
    return %c0_i32, %c0_i32_0 : i32, i32
  }
  func.func @transform_5(%arg0: i32) -> (i32, i32, i32) {
    %c0_i32 = arith.constant 0 : i32
    %c0_i32_0 = arith.constant 0 : i32
    %c0_i32_1 = arith.constant 0 : i32
    return %arg0, %c0_i32, %c0_i32_0 : i32, i32, i32
  }
}

</mosaic_0001>

<bundles_post_ra>
// kernel: apply_node_func.3
= control target key start
LH: loop header
LB: loop body
LE: loop exit
PB: predicated region body
PF: predicated region fallthrough
CT: control target
= control target key end

     0   :  { %s347_s9 = smov 0   ;;  %s373_s0 = inlined_call_operand.vmem [shape: f32[30,16], index: 0, kind: input, shape index: {}]   ;;  %s374_s1 = inlined_call_operand.vmem [shape: bf16[16,128], index: 1, kind: input, shape index: {}]   ;;  %s375_s2 = inlined_call_operand.vmem [shape: f32[2,8,128], index: 2, kind: output, shape index: {}]  }
   0x1 LB: > { %s353_s10 = sadd.s32 4294967295, %s328_s9   ;;  %p294_p0 = scmp.ge.s32.totalorder %s328_s9, 1  ;;  %s328_s9 = sphi %s347_s9, %s12_s9  }
   0x2   : > { %p113_p1 = scmp.lt.s32.totalorder %s328_s9, 3 }
   0x4   : > { %p114_p2 = pnand %p294_p0, %p113_p1 }
   0x5   : > { %v321_v0 = vld [vmem:[%s374_s1] sm:$0xff] (!%p114_p2)   ;;  %v330_v1 = vmov (!%p114_p2), 0.0   ;;  %s295_s13 = sshll.u32 (!%p114_p2), %s353_s10, 1  ;;  %vm331_vm0 = vmmov (!%p114_p2), 0   ;;  %vm156_vm1 = vcmask (!%p114_p2), 130048   ;;  %v202_v5 = vlaneseq (!%p114_p2)  ;;  %s300_s18 = sshll.u32 (!%p114_p2), %s353_s10, 4 }
   0x6   : > { %117 = sbr.rel (%p114_p2) target bundleno = 253 (0xfd), region = 28  ;;  %305 = vmatprep.subr.bf16.mxu0 (!%p114_p2), %v330_v1  ;;  %307 = vmatprep.mubr.msk.bf16.mxu0 (!%p114_p2), %vm331_vm0, %v330_v1  ;;  %p135_p3 = scmp.lt.s32.totalorder (!%p114_p2), %s295_s13, 3  ;;  %v205_v7 = vstv (!%p114_p2), %s300_s18 }
   0x7   : > { %306 = vmatpush3.bf16.msra.mxu0 (!%p114_p2), %v321_v0  ;;  %v203_v6 = vshrl.u32 (!%p114_p2), %v202_v5, 7  ;;  %p140_p4 = scmp.lt.s32.totalorder (!%p114_p2), %s353_s10, 1 }
   0x9   : > { %v204_v8 = vadd.s32 (!%p114_p2), 8, %v203_v6  ;;  %v206_v9 = vadd.s32 (!%p114_p2), %v205_v7, %v203_v6  ;;  %vm233_vm4 = vcmp.eq.s32.totalorder (!%p114_p2), %v203_v6, 1  ;;  %vm232_vm5 = vcmp.eq.s32.totalorder (!%p114_p2), %v203_v6, 0 }
   0xb   : > { %v207_v10 = vadd.s32 (!%p114_p2), %v205_v7, %v204_v8  ;;  %vm208_vm2 = vcmp.lt.s32.totalorder (!%p114_p2), %v206_v9, 30 }
   0xd   : > { %s377_s13 = smov (!%p135_p3, %s295_s13), 3  ;;  %vm209_vm3 = vcmp.lt.s32.totalorder %v207_v10, 30  ;;  %s379_s10 = smov (!%p140_p4, %s353_s10), 1 }
   0xe   : > { %s296_s14 = sshll.u32 %s377_s13, 3  ;;  %s297_s19 = sshll.u32 %s379_s10, 3 }
   0xf   : > { %s138_s17 = scalar_lea.vmem %s373_s0, %s296_s14  ;;  %s143_s22 = scalar_lea.vmem %s375_s2, %s297_s19 }
  0x10   : > { %v145_v2 = vld [vmem:[%s138_s17] sm:$0xff]  ;;  %v146_v3 = vld [vmem:[%s138_s17 + $0x8] sm:$0xff] }
  0x11   : > { %v147_v4 = vpack.c.bf16 %v146_v3, %v145_v2 }
  0x13   : > { %308 = vmatmul.mubr.msk.bf16.vlgmr.msra.gmra.mrb[0].mxu0 %vm156_vm1, %v147_v4 }
  0xe6   : > { %v194_v11 = vpop.f32.mrb[0].mxu0 }
  0xe7   : > { %v214_v12 = vsel %vm208_vm2, %v194_v11, 0.0  ;;  %v309_v13 = vpop.f32.mrb[1].mxu0 }
  0xe8   : > { %v197_v14 = vpop.f32.mrb[2].mxu0  ;;  %v223_v17 = vmul.f32 %v214_v12, %v214_v12 }
  0xe9   : > { %v215_v15 = vsel %vm209_vm3, %v197_v14, 0.0  ;;  %v310_v16 = vpop.f32.mrb[3].mxu0 }
  0xea   : > { %v216_v18 = vadd.f32 %v215_v15, %v214_v12  ;;  %v224_v19 = vmul.f32 %v215_v15, %v215_v15 }
  0xec   : > { %v217_v20 = vrot.slane %v216_v18, 4  ;;  %v225_v21 = vadd.f32 %v224_v19, %v223_v17 }
  0xee   : > { %v218_v22 = vadd.f32 %v217_v20, %v216_v18  ;;  %v226_v23 = vrot.slane %v225_v21, 4 }
  0xf0   : > { %v219_v24 = vrot.slane %v218_v22, 2  ;;  %v227_v25 = vadd.f32 %v226_v23, %v225_v21 }
  0xf2   : > { %v220_v26 = vadd.f32 %v219_v24, %v218_v22  ;;  %v228_v27 = vrot.slane %v227_v25, 2 }
  0xf4   : > { %v229_v28 = vadd.f32 %v228_v27, %v227_v25  ;;  %v221_v29 = vrot.slane %v220_v26, 1 }
  0xf6   : > { %v230_v30 = vrot.slane %v229_v28, 1  ;;  %v222_v32 = vadd.f32 %v221_v29, %v220_v26 }
  0xf8   : > { %v231_v31 = vadd.f32 %v230_v30, %v229_v28 }
  0xfa   : > { %v234_v33 = vsel %vm233_vm4, %v231_v31, 0.0 }
  0xfb   : > { %v235_v34 = vsel %vm232_vm5, %v222_v32, %v234_v33 }
  0xfc   : > { %236 = vst [vmem:[%s143_s22] sm:$0xff] %v235_v34 }
  0xfd PF: > { %s12_s9 = sadd.s32 1, %s328_s9  }
  0xfe   : > { %p9_p5 = scmp.ge.s32.totalorder %s12_s9, 4  }
 0x100   :  { %11 = sbr.rel (!%p9_p5) target bundleno = 1 (0x1), region = 58 }

// kernel: apply_node_func.4
= control target key start
LH: loop header
LB: loop body
LE: loop exit
PB: predicated region body
PF: predicated region fallthrough
CT: control target
= control target key end

     0   :  { %s616_s18 = smov 0   ;;  %s672_s0 = inlined_call_operand.vmem [shape: f32[30,16], index: 0, kind: input, shape index: {}]   ;;  %s673_s1 = inlined_call_operand.vmem [shape: bf16[16,128], index: 1, kind: input, shape index: {}]   ;;  %s674_s2 = inlined_call_operand.vmem [shape: f32[1,128], index: 2, kind: input, shape index: {}]   ;;  %s675_s3 = inlined_call_operand.vmem [shape: f32[1,128], index: 3, kind: input, shape index: {}]   ;;  %s676_s4 = inlined_call_operand.vmem [shape: bf16[128,128], index: 4, kind: input, shape index: {}]   ;;  %s677_s5 = inlined_call_operand.vmem [shape: f32[2,8,128], index: 5, kind: output, shape index: {}]  }
   0x1 LB: > { %s622_s19 = sadd.s32 4294967295, %s582_s18   ;;  %p501_p0 = scmp.ge.s32.totalorder %s582_s18, 1  ;;  %s582_s18 = sphi %s616_s18, %s15_s18  }
   0x2   : > { %p188_p1 = scmp.lt.s32.totalorder %s582_s18, 3 }
   0x4   : > { %p189_p2 = pnand %p501_p0, %p188_p1 }
   0x5   : > { %v567_v0 = vld [vmem:[%s673_s1] sm:$0xff] (!%p189_p2)   ;;  %v584_v1 = vmov (!%p189_p2), 0.0   ;;  %s502_s22 = sshll.u32 (!%p189_p2), %s622_s19, 1  ;;  %vm585_vm0 = vmmov (!%p189_p2), 0   ;;  %v569_v3 = vld [vmem:[%s676_s4 + $0x8] sm:$0xff] (!%p189_p2)   ;;  %v570_v4 = vld [vmem:[%s676_s4 + $0x10] sm:$0xff] (!%p189_p2)   ;;  %v409_v26 = vlaneseq (!%p189_p2) }
   0x6   : > { %192 = sbr.rel (%p189_p2) target bundleno = 475 (0x1db), region = 40  ;;  %531 = vmatprep.subr.bf16.mxu0 (!%p189_p2), %v584_v1  ;;  %537 = vmatprep.subr.bf16.mxu1 (!%p189_p2), %v584_v1  ;;  %v568_v2 = vld [vmem:[%s676_s4] sm:$0xff] (!%p189_p2)   ;;  %p216_p3 = scmp.lt.s32.totalorder (!%p189_p2), %s502_s22, 3  ;;  %vm237_vm1 = vcmask (!%p189_p2), 130048   ;;  %v571_v8 = vld [vmem:[%s676_s4 + $0x18] sm:$0xff] (!%p189_p2)   ;;  %v573_v10 = vld [vmem:[%s676_s4 + $0x28] sm:$0xff] (!%p189_p2)  }
   0x7   : > { %532 = vmatpush3.bf16.msra.mxu0 (!%p189_p2), %v567_v0  ;;  %533 = vmatprep.mubr.msk.bf16.mxu0 (!%p189_p2), %vm585_vm0, %v584_v1  ;;  %v572_v9 = vld [vmem:[%s676_s4 + $0x20] sm:$0xff] (!%p189_p2)   ;;  %v574_v11 = vld [vmem:[%s676_s4 + $0x30] sm:$0xff] (!%p189_p2)   ;;  %v575_v12 = vld [vmem:[%s676_s4 + $0x38] sm:$0xff] (!%p189_p2)   ;;  %s517_s24 = sshll.u32 (!%p189_p2), %s622_s19, 4  ;;  %v410_v27 = vshrl.u32 (!%p189_p2), %v409_v26, 7  ;;  %p221_p4 = scmp.lt.s32.totalorder (!%p189_p2), %s622_s19, 1 }
   0x8   : > { %538 = vmatpush3.bf16.msra.mxu1 (!%p189_p2), %v568_v2  ;;  %553 = vmatprep.mubr.msk.bf16.mxu1 (!%p189_p2), %vm585_vm0, %v584_v1  ;;  %v507_v13 = vld [vmem:[%s674_s2] ss:$0 sm:$0xff] (!%p189_p2)  ;;  %v412_v28 = vstv (!%p189_p2), %s517_s24 }
   0x9   : > { %539 = vmatprep.subr.bf16.mxu1 (!%p189_p2), %v584_v1  ;;  %v508_v15 = vld [vmem:[%s675_s3] ss:$0 sm:$0xff] (!%p189_p2)  ;;  %v411_v29 = vadd.s32 (!%p189_p2), 8, %v410_v27  ;;  %v413_v30 = vadd.s32 (!%p189_p2), %v412_v28, %v410_v27  ;;  %vm440_vm4 = vcmp.eq.s32.totalorder (!%p189_p2), %v410_v27, 1  ;;  %vm439_vm5 = vcmp.eq.s32.totalorder (!%p189_p2), %v410_v27, 0 }
   0xb   : > { %v414_v31 = vadd.s32 (!%p189_p2), %v412_v28, %v411_v29  ;;  %vm415_vm2 = vcmp.lt.s32.totalorder (!%p189_p2), %v413_v30, 30 }
   0xc   : > { %540 = vmatpush3.bf16.msra.mxu1 (!%p189_p2), %v569_v3 }
   0xd   : > { %s679_s22 = smov (!%p216_p3, %s502_s22), 3  ;;  %541 = vmatprep.subr.bf16.mxu1 %v584_v1  ;;  %vm416_vm3 = vcmp.lt.s32.totalorder %v414_v31, 30  ;;  %s681_s19 = smov (!%p221_p4, %s622_s19), 1 }
   0xe   : > { %s503_s27 = sshll.u32 %s679_s22, 3  ;;  %s504_s25 = sshll.u32 %s681_s19, 3 }
   0xf   : > { %s219_s7 = scalar_lea.vmem %s672_s0, %s503_s27  ;;  %s224_s28 = scalar_lea.vmem %s677_s5, %s504_s25 }
  0x10   : > { %v226_v5 = vld [vmem:[%s219_s7] sm:$0xff]  ;;  %v227_v6 = vld [vmem:[%s219_s7 + $0x8] sm:$0xff]  ;;  %542 = vmatpush3.bf16.msra.mxu1 %v570_v4 }
  0x11   : > { %v228_v7 = vpack.c.bf16 %v227_v6, %v226_v5  ;;  %543 = vmatprep.subr.bf16.mxu1 %v584_v1 }
  0x13   : > { %534 = vmatmul.mubr.msk.bf16.vlgmr.msra.gmra.mrb[0].mxu0 %vm237_vm1, %v228_v7 }
  0x14   : > { %544 = vmatpush3.bf16.msra.mxu1 %v571_v8 }
  0x15   : > { %545 = vmatprep.subr.bf16.mxu1 %v584_v1 }
  0x18   : > { %546 = vmatpush3.bf16.msra.mxu1 %v572_v9 }
  0x19   : > { %547 = vmatprep.subr.bf16.mxu1 %v584_v1 }
  0x1c   : > { %548 = vmatpush3.bf16.msra.mxu1 %v573_v10 }
  0x1d   : > { %549 = vmatprep.subr.bf16.mxu1 %v584_v1 }
  0x20   : > { %550 = vmatpush3.bf16.msra.mxu1 %v574_v11 }
  0x21   : > { %551 = vmatprep.subr.bf16.mxu1 %v584_v1 }
  0x24   : > { %552 = vmatpush3.bf16.msra.mxu1 %v575_v12 }
  0xe6   : > { %v275_v14 = vpop.f32.mrb[0].mxu0 }
  0xe7   : > { %v289_v16 = vmul.f32 %v507_v13, %v275_v14  ;;  %v535_v17 = vpop.f32.mrb[1].mxu0 }
  0xe8   : > { %v278_v18 = vpop.f32.mrb[2].mxu0 }
  0xe9   : > { %v298_v19 = vadd.f32 %v508_v15, %v289_v16  ;;  %v290_v20 = vmul.f32 %v507_v13, %v278_v18  ;;  %v536_v21 = vpop.f32.mrb[3].mxu0 }
  0xeb   : > { %v299_v22 = vadd.f32 %v508_v15, %v290_v20  ;;  %v300_v23 = vmax.f32 %v298_v19, 0.0 }
  0xed   : > { %v301_v24 = vmax.f32 %v299_v22, 0.0 }
  0xef   : > { %v302_v25 = vpack.c.bf16 %v301_v24, %v300_v23 }
  0xf1   : > { %554 = vmatmul.mubr.bf16.vlgmr.msra.gmra.mrb[0].mxu1 %v302_v25 }
 0x1c4   : > { %v401_v32 = vpop.f32.mrb[0].mxu1 }
 0x1c5   : > { %v421_v33 = vsel %vm415_vm2, %v401_v32, 0.0  ;;  %v555_v34 = vpop.f32.mrb[1].mxu1 }
 0x1c6   : > { %v404_v35 = vpop.f32.mrb[2].mxu1  ;;  %v430_v38 = vmul.f32 %v421_v33, %v421_v33 }
 0x1c7   : > { %v422_v36 = vsel %vm416_vm3, %v404_v35, 0.0  ;;  %v556_v37 = vpop.f32.mrb[3].mxu1 }
 0x1c8   : > { %v423_v39 = vadd.f32 %v422_v36, %v421_v33  ;;  %v431_v40 = vmul.f32 %v422_v36, %v422_v36 }
 0x1ca   : > { %v424_v41 = vrot.slane %v423_v39, 4  ;;  %v432_v42 = vadd.f32 %v431_v40, %v430_v38 }
 0x1cc   : > { %v425_v43 = vadd.f32 %v424_v41, %v423_v39  ;;  %v433_v44 = vrot.slane %v432_v42, 4 }
 0x1ce   : > { %v426_v45 = vrot.slane %v425_v43, 2  ;;  %v434_v46 = vadd.f32 %v433_v44, %v432_v42 }
 0x1d0   : > { %v427_v47 = vadd.f32 %v426_v45, %v425_v43  ;;  %v435_v48 = vrot.slane %v434_v46, 2 }
 0x1d2   : > { %v436_v49 = vadd.f32 %v435_v48, %v434_v46  ;;  %v428_v50 = vrot.slane %v427_v47, 1 }
 0x1d4   : > { %v437_v51 = vrot.slane %v436_v49, 1  ;;  %v429_v53 = vadd.f32 %v428_v50, %v427_v47 }
 0x1d6   : > { %v438_v52 = vadd.f32 %v437_v51, %v436_v49 }
 0x1d8   : > { %v441_v54 = vsel %vm440_vm4, %v438_v52, 0.0 }
 0x1d9   : > { %v442_v55 = vsel %vm439_vm5, %v429_v53, %v441_v54 }
 0x1da   : > { %443 = vst [vmem:[%s224_s28] sm:$0xff] %v442_v55 }
 0x1db PF: > { %s15_s18 = sadd.s32 1, %s582_s18  }
 0x1dc   : > { %p12_p5 = scmp.ge.s32.totalorder %s15_s18, 4  }
 0x1de   :  { %14 = sbr.rel (!%p12_p5) target bundleno = 1 (0x1), region = 70 }

// kernel: apply_node_func.5
= control target key start
LH: loop header
LB: loop body
LE: loop exit
PB: predicated region body
PF: predicated region fallthrough
CT: control target
= control target key end

     0   :  { %s675_s24 = smov 0   ;;  %s738_s0 = inlined_call_operand.vmem [shape: f32[30,16], index: 0, kind: input, shape index: {}]   ;;  %s739_s1 = inlined_call_operand.vmem [shape: bf16[16,128], index: 1, kind: input, shape index: {}]   ;;  %s740_s2 = inlined_call_operand.vmem [shape: f32[1,128], index: 2, kind: input, shape index: {}]   ;;  %s741_s3 = inlined_call_operand.vmem [shape: f32[1,128], index: 3, kind: input, shape index: {}]   ;;  %s742_s4 = inlined_call_operand.vmem [shape: bf16[128,128], index: 4, kind: input, shape index: {}]   ;;  %s743_s5 = inlined_call_operand.vmem [shape: f32[1,128], index: 5, kind: input, shape index: {}]   ;;  %s744_s6 = inlined_call_operand.vmem [shape: f32[1,128], index: 6, kind: input, shape index: {}]   ;;  %s745_s7 = inlined_call_operand.vmem [shape: f32[30,24], index: 7, kind: output, shape index: {}]  }
   0x1 LB: > { %s544_s25 = sadd.s32 4294967295, %s631_s24   ;;  %p548_p0 = scmp.ge.s32.totalorder %s631_s24, 1  ;;  %s631_s24 = sphi %s675_s24, %s17_s24  }
   0x2   : > { %p238_p1 = scmp.lt.s32.totalorder %s631_s24, 3 }
   0x4   : > { %p239_p2 = pnand %p548_p0, %p238_p1 }
   0x5   : > { %v616_v0 = vld [vmem:[%s739_s1] sm:$0xff] (!%p239_p2)   ;;  %v633_v1 = vmov (!%p239_p2), 0.0   ;;  %s549_s28 = sshll.u32 (!%p239_p2), %s544_s25, 1  ;;  %vm634_vm0 = vmmov (!%p239_p2), 0   ;;  %v618_v3 = vld [vmem:[%s742_s4 + $0x8] sm:$0xff] (!%p239_p2)   ;;  %v619_v4 = vld [vmem:[%s742_s4 + $0x10] sm:$0xff] (!%p239_p2)  }
   0x6   : > { %242 = sbr.rel (%p239_p2) target bundleno = 462 (0x1ce), region = 48  ;;  %580 = vmatprep.subr.bf16.mxu0 (!%p239_p2), %v633_v1  ;;  %586 = vmatprep.subr.bf16.mxu1 (!%p239_p2), %v633_v1  ;;  %v617_v2 = vld [vmem:[%s742_s4] sm:$0xff] (!%p239_p2)   ;;  %p271_p3 = scmp.lt.s32.totalorder (!%p239_p2), %s549_s28, 3  ;;  %vm294_vm1 = vcmask (!%p239_p2), 130048   ;;  %v620_v8 = vld [vmem:[%s742_s4 + $0x18] sm:$0xff] (!%p239_p2)   ;;  %v622_v10 = vld [vmem:[%s742_s4 + $0x28] sm:$0xff] (!%p239_p2)  }
   0x7   : > { %581 = vmatpush3.bf16.msra.mxu0 (!%p239_p2), %v616_v0  ;;  %582 = vmatprep.mubr.msk.bf16.mxu0 (!%p239_p2), %vm634_vm0, %v633_v1  ;;  %v621_v9 = vld [vmem:[%s742_s4 + $0x20] sm:$0xff] (!%p239_p2)   ;;  %v623_v11 = vld [vmem:[%s742_s4 + $0x30] sm:$0xff] (!%p239_p2)   ;;  %v624_v12 = vld [vmem:[%s742_s4 + $0x38] sm:$0xff] (!%p239_p2)   ;;  %vm485_vm2 = vcmask (!%p239_p2), 195584  }
   0x8   : > { %587 = vmatpush3.bf16.msra.mxu1 (!%p239_p2), %v617_v2  ;;  %602 = vmatprep.mubr.msk.bf16.mxu1 (!%p239_p2), %vm634_vm0, %v633_v1  ;;  %v555_v13 = vld [vmem:[%s740_s2] ss:$0 sm:$0xff] (!%p239_p2) }
   0x9   : > { %588 = vmatprep.subr.bf16.mxu1 (!%p239_p2), %v633_v1  ;;  %v556_v15 = vld [vmem:[%s741_s3] ss:$0 sm:$0xff] (!%p239_p2) }
   0xa   : > { %v565_v26 = vld [vmem:[%s743_s5] ss:$0 sm:$0xff] (!%p239_p2) }
   0xb   : > { %v566_v28 = vld [vmem:[%s744_s6] ss:$0 sm:$0xff] (!%p239_p2) }
   0xc   : > { %589 = vmatpush3.bf16.msra.mxu1 (!%p239_p2), %v618_v3 }
   0xd   : > { %s747_s28 = smov (!%p271_p3, %s549_s28), 3  ;;  %590 = vmatprep.subr.bf16.mxu1 %v633_v1 }
   0xe   : > { %s550_s10 = sshll.u32 %s747_s28, 3 }
   0xf   : > { %s274_s15 = scalar_lea.vmem %s738_s0, %s550_s10  ;;  %s280_s16 = scalar_lea.vmem %s745_s7, %s550_s10 }
  0x10   : > { %v283_v5 = vld [vmem:[%s274_s15] sm:$0xff]  ;;  %v284_v6 = vld [vmem:[%s274_s15 + $0x8] sm:$0xff]  ;;  %591 = vmatpush3.bf16.msra.mxu1 %v619_v4 }
  0x11   : > { %v285_v7 = vpack.c.bf16 %v284_v6, %v283_v5  ;;  %592 = vmatprep.subr.bf16.mxu1 %v633_v1 }
  0x13   : > { %583 = vmatmul.mubr.msk.bf16.vlgmr.msra.gmra.mrb[0].mxu0 %vm294_vm1, %v285_v7 }
  0x14   : > { %593 = vmatpush3.bf16.msra.mxu1 %v620_v8 }
  0x15   : > { %594 = vmatprep.subr.bf16.mxu1 %v633_v1 }
  0x18   : > { %595 = vmatpush3.bf16.msra.mxu1 %v621_v9 }
  0x19   : > { %596 = vmatprep.subr.bf16.mxu1 %v633_v1 }
  0x1c   : > { %597 = vmatpush3.bf16.msra.mxu1 %v622_v10 }
  0x1d   : > { %598 = vmatprep.subr.bf16.mxu1 %v633_v1 }
  0x20   : > { %599 = vmatpush3.bf16.msra.mxu1 %v623_v11 }
  0x21   : > { %600 = vmatprep.subr.bf16.mxu1 %v633_v1 }
  0x24   : > { %601 = vmatpush3.bf16.msra.mxu1 %v624_v12 }
  0xe6   : > { %v332_v14 = vpop.f32.mrb[0].mxu0 }
  0xe7   : > { %v346_v16 = vmul.f32 %v555_v13, %v332_v14  ;;  %v584_v17 = vpop.f32.mrb[1].mxu0 }
  0xe8   : > { %v335_v18 = vpop.f32.mrb[2].mxu0 }
  0xe9   : > { %v355_v19 = vadd.f32 %v556_v15, %v346_v16  ;;  %v347_v20 = vmul.f32 %v555_v13, %v335_v18  ;;  %v585_v21 = vpop.f32.mrb[3].mxu0 }
  0xeb   : > { %v356_v22 = vadd.f32 %v556_v15, %v347_v20  ;;  %v357_v23 = vmax.f32 %v355_v19, 0.0 }
  0xed   : > { %v358_v24 = vmax.f32 %v356_v22, 0.0 }
  0xef   : > { %v359_v25 = vpack.c.bf16 %v358_v24, %v357_v23 }
  0xf1   : > { %603 = vmatmul.mubr.bf16.vlgmr.msra.gmra.mrb[0].mxu1 %v359_v25 }
 0x1c4   : > { %v458_v27 = vpop.f32.mrb[0].mxu1 }
 0x1c5   : > { %v472_v29 = vmul.f32 %v565_v26, %v458_v27  ;;  %v604_v30 = vpop.f32.mrb[1].mxu1 }
 0x1c6   : > { %v461_v31 = vpop.f32.mrb[2].mxu1 }
 0x1c7   : > { %v481_v32 = vadd.f32 %v566_v28, %v472_v29  ;;  %v473_v33 = vmul.f32 %v565_v26, %v461_v31  ;;  %v605_v34 = vpop.f32.mrb[3].mxu1 }
 0x1c9   : > { %v483_v35 = vmax.f32 %v481_v32, 0.0  ;;  %v482_v36 = vadd.f32 %v566_v28, %v473_v33 }
 0x1cb   : > { %486 = vst.msk [vmem:[%s280_s16] sm:$0xff] %vm485_vm2, %v483_v35  ;;  %v484_v37 = vmax.f32 %v482_v36, 0.0 }
 0x1cd   : > { %487 = vst.msk [vmem:[%s280_s16 + $0x8] sm:$0xff] %vm485_vm2, %v484_v37 }
 0x1ce PF: > { %s17_s24 = sadd.s32 1, %s631_s24  }
 0x1cf   : > { %p14_p4 = scmp.ge.s32.totalorder %s17_s24, 4  }
 0x1d1   :  { %16 = sbr.rel (!%p14_p4) target bundleno = 1 (0x1), region = 78 }

</bundles_post_ra>
